<compile_context>
chip_gen: v5e
topology: v5e:2x2
jax: 0.10.0
libtpu: 0.0.40
codegen_flags: <defaults>
</compile_context>

<pallas_src>
import numpy as np

import jax
import jax.numpy as jnp
from jax import lax
from jax.experimental import pallas as pl
from jax.experimental.pallas import tpu as pltpu

# ---------------- configuration (small, consistent with the module) ----------------
IN_DIMS = [12, 16, 20]          # per-node-type raw feature dims
NODE_CNTS = [10, 12, 10]        # nodes per type
N = sum(NODE_CNTS)              # 32 total nodes
NUM_HIDDEN = 32
NUM_CLASSES = 5
NUM_LAYERS = 2                  # -> GraphConv layer list has NUM_LAYERS + 1 entries

H = NUM_HIDDEN
K_TOTAL = sum(IN_DIMS)          # 48  (stacked per-type feature dims)
K_AUG = K_TOTAL + len(IN_DIMS)  # 51  (+ one-hot type block that carries fc biases)
K_PAD = 64                      # padded fused-fc contraction dim (zeros beyond K_AUG)
C_PAD = 96                      # logits padded width inside the output slab
OUT_W = H + C_PAD               # 128-lane-dense output slab width

# Rows of the packed parameter slab (see pack_params)
P_ROWS, P_COLS = K_PAD + 2 * H, 128         # (128, 128)

# Constant one-hot "node type" block (numpy constant, baked into the jit).
_TYPE_ONEHOT = np.zeros((N, K_PAD), np.float32)
_r = 0
for _t, _cnt in enumerate(NODE_CNTS):
    _TYPE_ONEHOT[_r:_r + _cnt, K_TOTAL + _t] = 1.0
    _r += _cnt


# ---------------- the single fused Pallas kernel ----------------
def _gcn_fused_kernel(adj_ref, x_ref, p_ref, out_ref):
    """Whole GCN forward for NUM_LAYERS=2 (3 GraphConv layers) in one invocation.

    adj_ref: (N, N)      dense adjacency (undirected + self-loops)
    x_ref:   (N, K_PAD)  block-diagonal per-type features + one-hot type block (zero-padded)
    p_ref:   (128, 128)  packed parameter slab (fc weights+biases, W1, b0/b1, W2/b2 padded)
    out_ref: (N, 128)    [ encoded (32 lanes) | logits padded to 96 lanes ]
    """
    adj = adj_ref[...]                                                    # (N, N)

    # Undirected graph with self-loops => in-degree == out-degree:
    # one reduction + one rsqrt, scalings folded elementwise around the aggregation matmul.
    inv = lax.rsqrt(jnp.maximum(jnp.sum(adj, axis=1, keepdims=True), 1.0))  # (N, 1)

    def agg(h):  # D^{-1/2} A D^{-1/2} h
        return inv * jnp.dot(adj, inv * h, preferred_element_type=jnp.float32)

    def elu(x):
        return jnp.where(x > 0.0, x, jnp.exp(jnp.minimum(x, 0.0)) - 1.0)

    # Static views into the packed parameter slab (one DMA'd operand).
    w_in = p_ref[0:K_PAD, 0:H]                         # fused fc weights + bias rows
    w1   = p_ref[K_PAD:K_PAD + H, 0:H]                 # middle GraphConv weight
    w2p  = p_ref[K_PAD + H:K_PAD + 2 * H, 0:C_PAD]     # final GraphConv weight, 0-padded
    b0   = p_ref[K_PAD:K_PAD + 1, H:2 * H]             # GraphConv-0 bias (weight=False)
    b1   = p_ref[K_PAD + 8:K_PAD + 9, H:2 * H]         # middle GraphConv bias
    b2p  = p_ref[K_PAD + 16:K_PAD + 17, H:H + C_PAD]   # final GraphConv bias, 0-padded

    # fused fc_list: one matmul does all three type-specific Linears (weights + biases).
    h = jnp.dot(x_ref[...], w_in, preferred_element_type=jnp.float32)     # (N, H)

    # layer 0: GraphConv(H, H, activation, weight=False)
    h = elu(agg(h) + b0)

    # layer 1: GraphConv(H, H, activation)
    h = elu(jnp.dot(agg(h), w1, preferred_element_type=jnp.float32) + b1)

    # layer 2: GraphConv(H, C), no activation; in_feats > out_feats => weight before agg
    # (mathematically identical either way).  Padded W2/b2 columns stay exactly zero.
    logits_p = agg(jnp.dot(h, w2p, preferred_element_type=jnp.float32)) + b2p   # (N, C_PAD)

    # Single lane-dense (N, 128) writeback: [encoded | padded logits].
    out_ref[...] = jnp.concatenate([h, logits_p], axis=-1)


# ---------------- parameter packing (called ONCE, outside the hot path) ----------------
def pack_params(params):
    """Pack every GCN parameter into one (128, 128) f32 slab (zero-padded, one DMA)."""
    slab = jnp.zeros((P_ROWS, P_COLS), jnp.float32)
    # fused fc: stacked per-type weights, then per-type bias rows selected by the one-hot block
    w_stack = jnp.concatenate([p["w"] for p in params["fc_list"]], axis=0)   # (K_TOTAL, H)
    slab = slab.at[0:K_TOTAL, 0:H].set(w_stack)
    for t, p in enumerate(params["fc_list"]):
        slab = slab.at[K_TOTAL + t, 0:H].set(p["b"])
    # GraphConv weights
    slab = slab.at[K_PAD:K_PAD + H, 0:H].set(params["layers"][1]["w"])
    slab = slab.at[K_PAD + H:K_PAD + 2 * H, 0:NUM_CLASSES].set(params["layers"][2]["w"])
    # GraphConv biases (rows aligned to sublane multiples of 8, unused column region)
    slab = slab.at[K_PAD, H:2 * H].set(params["layers"][0]["b"])
    slab = slab.at[K_PAD + 8, H:2 * H].set(params["layers"][1]["b"])
    slab = slab.at[K_PAD + 16, H:H + NUM_CLASSES].set(params["layers"][2]["b"])
    return slab


# ---------------- wrapper ----------------
@jax.jit
def gcn_forward(param_slab, features_list, adj, e_feat=None):
    """GCN.forward(features_list, e_feat): returns (h, encoded_embeddings).

    e_feat is accepted for signature parity but unused (as in the reference GCN)."""
    del e_feat
    # Fused feature matrix: block-diagonal per-type features + constant one-hot type block.
    blocks, col = [], 0
    for f in features_list:
        dim = int(f.shape[1])
        blocks.append(jnp.pad(f.astype(jnp.float32), ((0, 0), (col, K_PAD - col - dim))))
        col += dim
    x_aug = jnp.concatenate(blocks, axis=0) + jnp.asarray(_TYPE_ONEHOT)      # (N, K_PAD)

    vmem = pl.BlockSpec(memory_space=pltpu.MemorySpace.VMEM)   # whole-array blocks in VMEM
    out_slab = pl.pallas_call(
        _gcn_fused_kernel,
        out_shape=jax.ShapeDtypeStruct((N, OUT_W), jnp.float32),
        in_specs=[vmem, vmem, vmem],
        out_specs=vmem,
    )(adj, x_aug, param_slab)

    encoded = out_slab[:, :NUM_HIDDEN]
    logits = out_slab[:, NUM_HIDDEN:NUM_HIDDEN + NUM_CLASSES]
    return logits, encoded


# ---------------- pure-JAX reference (for correctness check) ----------------
def _reference_forward(params, features_list, adj):
    hs = [f @ p["w"] + p["b"] for f, p in zip(features_list, params["fc_list"])]
    h = jnp.concatenate(hs, axis=0)
    deg_dst = jnp.maximum(adj.sum(1, keepdims=True), 1.0)
    deg_src = jnp.maximum(adj.sum(0, keepdims=True), 1.0)
    a_norm = adj / jnp.sqrt(deg_dst) / jnp.sqrt(deg_src)
    elu = lambda x: jnp.where(x > 0.0, x, jnp.exp(jnp.minimum(x, 0.0)) - 1.0)
    layers = params["layers"]
    h = elu(a_norm @ h + layers[0]["b"])                     # GraphConv(H,H,act,weight=False)
    for lp in layers[1:-1]:                                  # middle GraphConv(H,H,act)
        h = elu((a_norm @ h) @ lp["w"] + lp["b"])
    encoded = h
    h = a_norm @ (h @ layers[-1]["w"]) + layers[-1]["b"]     # GraphConv(H,C), no activation
    return h, encoded


# ---------------- deterministic parameter / graph construction ----------------
def xavier_normal(key, shape, gain=1.0):
    fan_in, fan_out = shape
    std = gain * (2.0 / (fan_in + fan_out)) ** 0.5
    return std * jax.random.normal(key, shape, dtype=jnp.float32)


def make_params(key):
    keys = iter(jax.random.split(key, 32))
    params = {"fc_list": [], "layers": []}
    for in_dim in IN_DIMS:
        params["fc_list"].append({
            "w": xavier_normal(next(keys), (in_dim, NUM_HIDDEN), gain=1.414),
            "b": 0.1 * jax.random.normal(next(keys), (NUM_HIDDEN,), dtype=jnp.float32),
        })
    # [GraphConv(H,H,act,weight=False)] + (NUM_LAYERS-1)*[GraphConv(H,H,act)] + [GraphConv(H,C)]
    params["layers"].append({"b": jnp.zeros((NUM_HIDDEN,), jnp.float32)})   # weight=False
    for _ in range(NUM_LAYERS - 1):
        params["layers"].append({
            "w": xavier_normal(next(keys), (NUM_HIDDEN, NUM_HIDDEN)),
            "b": jnp.zeros((NUM_HIDDEN,), jnp.float32),
        })
    params["layers"].append({
        "w": xavier_normal(next(keys), (NUM_HIDDEN, NUM_CLASSES)),
        "b": jnp.zeros((NUM_CLASSES,), jnp.float32),
    })
    return params


def make_graph(key):
    rand_adj = (jax.random.uniform(key, (N, N)) < 0.2).astype(jnp.float32)
    adj = jnp.maximum(rand_adj, rand_adj.T)                   # symmetric edges (undirected)
    adj = jnp.maximum(adj, jnp.eye(N, dtype=jnp.float32))     # self-loops (no 0-degree nodes)
    return adj


if __name__ == "__main__":
    root = jax.random.PRNGKey(0)
    k_params, k_graph, k_feat = jax.random.split(root, 3)

    params = make_params(k_params)
    adj = make_graph(k_graph)

    feat_keys = jax.random.split(k_feat, len(IN_DIMS))
    features_list = [
        jax.random.normal(fk, (cnt, dim), dtype=jnp.float32)
        for fk, cnt, dim in zip(feat_keys, NODE_CNTS, IN_DIMS)
    ]

    param_slab = pack_params(params)            # one-time packing, outside the hot path

    logits, encoded = gcn_forward(param_slab, features_list, adj)
    jax.block_until_ready((logits, encoded))

    ref_logits, ref_encoded = _reference_forward(params, features_list, adj)

    assert logits.shape == (N, NUM_CLASSES)
    assert encoded.shape == (N, NUM_HIDDEN)
    assert bool(jnp.all(jnp.isfinite(logits)))
    assert bool(jnp.all(jnp.isfinite(encoded)))
    assert bool(jnp.allclose(logits, ref_logits, rtol=1e-4, atol=1e-4))
    assert bool(jnp.allclose(encoded, ref_encoded, rtol=1e-4, atol=1e-4))
    print("KERNEL_OK")
</pallas_src>

<mosaic_0001>
module attributes {stable_mosaic.version = 11 : i64} {
  func.func @_gcn_fused_kernel(%arg0: memref<32x32xf32, #tpu.memory_space<vmem>>, %arg1: memref<32x64xf32, #tpu.memory_space<vmem>>, %arg2: memref<128x128xf32, #tpu.memory_space<vmem>>, %arg3: memref<32x128xf32, #tpu.memory_space<vmem>>) attributes {dimension_semantics = [], scalar_prefetch = 0 : i64, scratch_operands = 0 : i64, tpu.core_type = #tpu.core_type<tc>} {
    %c0 = arith.constant 0 : index
    %c0_0 = arith.constant 0 : index
    %0 = vector.load %arg0[%c0, %c0_0] : memref<32x32xf32, #tpu.memory_space<vmem>>, vector<32x32xf32>
    %cst = arith.constant dense<0.000000e+00> : vector<32xf32>
    %1 = vector.multi_reduction <add>, %0, %cst [1] : vector<32x32xf32> to vector<32xf32>
    %2 = vector.shape_cast %1 : vector<32xf32> to vector<32x1xf32>
    %cst_1 = arith.constant 1.000000e+00 : f32
    %3 = vector.broadcast %cst_1 : f32 to vector<32x1xf32>
    %4 = arith.maximumf %2, %3 : vector<32x1xf32>
    %5 = math.rsqrt %4 : vector<32x1xf32>
    %c0_2 = arith.constant 0 : index
    %c0_3 = arith.constant 0 : index
    %6 = vector.load %arg2[%c0_2, %c0_3] : memref<128x128xf32, #tpu.memory_space<vmem>>, vector<64x32xf32>
    %c64 = arith.constant 64 : index
    %c0_4 = arith.constant 0 : index
    %7 = vector.load %arg2[%c64, %c0_4] : memref<128x128xf32, #tpu.memory_space<vmem>>, vector<32x32xf32>
    %c96 = arith.constant 96 : index
    %c0_5 = arith.constant 0 : index
    %8 = vector.load %arg2[%c96, %c0_5] : memref<128x128xf32, #tpu.memory_space<vmem>>, vector<32x96xf32>
    %c64_6 = arith.constant 64 : index
    %c32 = arith.constant 32 : index
    %9 = vector.load %arg2[%c64_6, %c32] : memref<128x128xf32, #tpu.memory_space<vmem>>, vector<1x32xf32>
    %c72 = arith.constant 72 : index
    %c32_7 = arith.constant 32 : index
    %10 = vector.load %arg2[%c72, %c32_7] : memref<128x128xf32, #tpu.memory_space<vmem>>, vector<1x32xf32>
    %c80 = arith.constant 80 : index
    %c32_8 = arith.constant 32 : index
    %11 = vector.load %arg2[%c80, %c32_8] : memref<128x128xf32, #tpu.memory_space<vmem>>, vector<1x96xf32>
    %c0_9 = arith.constant 0 : index
    %c0_10 = arith.constant 0 : index
    %12 = vector.load %arg1[%c0_9, %c0_10] : memref<32x64xf32, #tpu.memory_space<vmem>>, vector<32x64xf32>
    %cst_11 = arith.constant dense<0.000000e+00> : vector<32x32xf32>
    %13 = tpu.matmul %12, %6, %cst_11 {dimension_numbers = #tpu.dot_dimension_numbers<[1], [0], [0], [1], [0, 0, 1, 1], [], []>} : vector<32x64xf32>, vector<64x32xf32>, vector<32x32xf32> -> vector<32x32xf32>
    %14 = vector.broadcast %5 : vector<32x1xf32> to vector<32x32xf32>
    %15 = arith.mulf %14, %13 : vector<32x32xf32>
    %cst_12 = arith.constant dense<0.000000e+00> : vector<32x32xf32>
    %16 = tpu.matmul %0, %15, %cst_12 {dimension_numbers = #tpu.dot_dimension_numbers<[1], [0], [0], [1], [0, 0, 1, 1], [], []>} : vector<32x32xf32>, vector<32x32xf32>, vector<32x32xf32> -> vector<32x32xf32>
    %17 = vector.broadcast %5 : vector<32x1xf32> to vector<32x32xf32>
    %18 = arith.mulf %17, %16 : vector<32x32xf32>
    %19 = vector.broadcast %9 : vector<1x32xf32> to vector<32x32xf32>
    %20 = arith.addf %18, %19 : vector<32x32xf32>
    %cst_13 = arith.constant 0.000000e+00 : f32
    %21 = vector.broadcast %cst_13 : f32 to vector<32x32xf32>
    %22 = arith.cmpf ogt, %20, %21 : vector<32x32xf32>
    %cst_14 = arith.constant 0.000000e+00 : f32
    %23 = vector.broadcast %cst_14 : f32 to vector<32x32xf32>
    %24 = arith.minimumf %20, %23 : vector<32x32xf32>
    %25 = math.exp %24 : vector<32x32xf32>
    %cst_15 = arith.constant 1.000000e+00 : f32
    %26 = vector.broadcast %cst_15 : f32 to vector<32x32xf32>
    %27 = arith.subf %25, %26 : vector<32x32xf32>
    %28 = arith.select %22, %20, %27 : vector<32x32xi1>, vector<32x32xf32>
    %29 = vector.broadcast %5 : vector<32x1xf32> to vector<32x32xf32>
    %30 = arith.mulf %29, %28 : vector<32x32xf32>
    %cst_16 = arith.constant dense<0.000000e+00> : vector<32x32xf32>
    %31 = tpu.matmul %0, %30, %cst_16 {dimension_numbers = #tpu.dot_dimension_numbers<[1], [0], [0], [1], [0, 0, 1, 1], [], []>} : vector<32x32xf32>, vector<32x32xf32>, vector<32x32xf32> -> vector<32x32xf32>
    %32 = vector.broadcast %5 : vector<32x1xf32> to vector<32x32xf32>
    %33 = arith.mulf %32, %31 : vector<32x32xf32>
    %cst_17 = arith.constant dense<0.000000e+00> : vector<32x32xf32>
    %34 = tpu.matmul %33, %7, %cst_17 {dimension_numbers = #tpu.dot_dimension_numbers<[1], [0], [0], [1], [0, 0, 1, 1], [], []>} : vector<32x32xf32>, vector<32x32xf32>, vector<32x32xf32> -> vector<32x32xf32>
    %35 = vector.broadcast %10 : vector<1x32xf32> to vector<32x32xf32>
    %36 = arith.addf %34, %35 : vector<32x32xf32>
    %cst_18 = arith.constant 0.000000e+00 : f32
    %37 = vector.broadcast %cst_18 : f32 to vector<32x32xf32>
    %38 = arith.cmpf ogt, %36, %37 : vector<32x32xf32>
    %cst_19 = arith.constant 0.000000e+00 : f32
    %39 = vector.broadcast %cst_19 : f32 to vector<32x32xf32>
    %40 = arith.minimumf %36, %39 : vector<32x32xf32>
    %41 = math.exp %40 : vector<32x32xf32>
    %cst_20 = arith.constant 1.000000e+00 : f32
    %42 = vector.broadcast %cst_20 : f32 to vector<32x32xf32>
    %43 = arith.subf %41, %42 : vector<32x32xf32>
    %44 = arith.select %38, %36, %43 : vector<32x32xi1>, vector<32x32xf32>
    %cst_21 = arith.constant dense<0.000000e+00> : vector<32x96xf32>
    %45 = tpu.matmul %44, %8, %cst_21 {dimension_numbers = #tpu.dot_dimension_numbers<[1], [0], [0], [1], [0, 0, 1, 1], [], []>} : vector<32x32xf32>, vector<32x96xf32>, vector<32x96xf32> -> vector<32x96xf32>
    %46 = vector.broadcast %5 : vector<32x1xf32> to vector<32x96xf32>
    %47 = arith.mulf %46, %45 : vector<32x96xf32>
    %cst_22 = arith.constant dense<0.000000e+00> : vector<32x96xf32>
    %48 = tpu.matmul %0, %47, %cst_22 {dimension_numbers = #tpu.dot_dimension_numbers<[1], [0], [0], [1], [0, 0, 1, 1], [], []>} : vector<32x32xf32>, vector<32x96xf32>, vector<32x96xf32> -> vector<32x96xf32>
    %49 = vector.broadcast %5 : vector<32x1xf32> to vector<32x96xf32>
    %50 = arith.mulf %49, %48 : vector<32x96xf32>
    %51 = vector.broadcast %11 : vector<1x96xf32> to vector<32x96xf32>
    %52 = arith.addf %50, %51 : vector<32x96xf32>
    %53 = tpu.concatenate %44, %52 in 1 : vector<32x32xf32>, vector<32x96xf32> -> vector<32x128xf32>
    %c0_23 = arith.constant 0 : index
    %c0_24 = arith.constant 0 : index
    %54 = vector.load %arg3[%c0_23, %c0_24] : memref<32x128xf32, #tpu.memory_space<vmem>>, vector<32x128xf32>
    tpu.vector_store %arg3[%c0_23, %c0_24], %53 {strides = array<i32>} : memref<32x128xf32, #tpu.memory_space<vmem>>, vector<32x128xf32>,
    return
  }
}

</mosaic_0001>

<bundles_post_ra>
// kernel: gcn_forward.1
= control target key start
LH: loop header
LB: loop body
LE: loop exit
PB: predicated region body
PF: predicated region fallthrough
CT: control target
= control target key end

     0   :  { %8 = vsyncpa [#allocation3], 0  ;;  %s559_s15 = smov [#allocation2]   ;;  %s560_s17 = smov 128   ;;  %s714_s0 = inlined_call_operand.vmem [shape: f32[32,32], index: 0, kind: input, shape index: {}]   ;;  %s715_s1 = inlined_call_operand.vmem [shape: f32[32,64], index: 1, kind: input, shape index: {}]   ;;  %s716_s2 = inlined_call_operand.hbm [shape: f32[128,128], index: 2, kind: input, shape index: {}]   ;;  %s717_s3 = inlined_call_operand.vmem [shape: f32[32,128], index: 3, kind: output, shape index: {}]  }
   0x1   :  { %s17_s14 = sshll.u32 %s716_s2, 4  ;;  %s19_s16 = sshll.u32 %s559_s15, 4  ;;  %s18_s14 = int_to_ptr.hbm [resolvable:$true] %s17_s14  ;;  %s20_s16 = int_to_ptr.vmem [resolvable:$true] %s19_s16 }
   0x2   :  { %s561_s18 = smov 8  }
   0x3   :  { %25 = dma.hbm_to_vmem [thread:$0]  %s18_s14, 2048, %s20_s16, [#allocation3], %s560_s17, %s560_s17, %s561_s18  }
   0x4   :  { %557 = dma.done.wait [#allocation3], 2048  }
   0x5   :  { %558 = vsyncadd [#allocation3], 4294965248  ;;  %vm34_vm0 = vcmask 261120   ;;  %v98_v0 = vld [vmem:[#allocation2 + $0x38] sm:$0xff]  ;;  %v590_v1 = vld [vmem:[%s714_s0 + $0x8] sm:$0xff]  ;;  %vm114_vm1 = vcmask 523264  }
   0x6   :  { %v97_v2 = vld [vmem:[#allocation2 + $0x30] sm:$0xff]  ;;  %135 = vmatpush.msra.mxu0 %v98_v0  ;;  %v38_v3 = vsel %vm34_vm0, %v590_v1, 0.0  ;;  %v96_v4 = vld [vmem:[#allocation2 + $0x28] sm:$0xff]  ;;  %v597_v5 = vld [vmem:[%s714_s0 + $0x18] sm:$0xff]  ;;  %s563_s6 = smov 32  }
   0x7   :  { %39 = vadd.xlane.f32.xlu1 %v38_v3  ;;  %v44_v6 = vsel %vm34_vm0, %v597_v5, 0.0  ;;  %v95_v7 = vld [vmem:[#allocation2 + $0x20] sm:$0xff]  ;;  %v94_v9 = vld [vmem:[#allocation2 + $0x18] sm:$0xff]  ;;  %v609_v10 = vld [vmem:[%s714_s0 + $0x10] sm:$0xff] }
   0x8   :  { %136 = vmatpush.msra.mxu0 %v97_v2  ;;  %45 = vadd.xlane.f32.xlu0 %v44_v6  ;;  %v604_v8 = vld [vmem:[%s714_s0] sm:$0xff]  ;;  %v93_v12 = vld [vmem:[#allocation2 + $0x10] sm:$0xff]  ;;  %v41_v13 = vsel %vm34_vm0, %v609_v10, 0.0  ;;  %v92_v14 = vld [vmem:[#allocation2 + $0x8] sm:$0xff] }
   0x9   :  { %v35_v11 = vsel %vm34_vm0, %v604_v8, 0.0  ;;  %v91_v15 = vld [vmem:[#allocation2] sm:$0xff]  ;;  %v111_v17 = vld [vmem:[%s715_s1 + $0x8] sm:$0xff]  ;;  %v112_v18 = vld [vmem:[%s715_s1 + $0x10] sm:$0xff] }
   0xa   :  { %137 = vmatpush.msra.mxu0 %v96_v4  ;;  %v110_v16 = vld [vmem:[%s715_s1] sm:$0xff]  ;;  %v113_v19 = vld [vmem:[%s715_s1 + $0x18] sm:$0xff]  ;;  %s562_s1 = smov 96  }
   0xb   :  { %v506_v50 = vld [vmem:[#allocation2 + $0x40] ss:$0 sm:$0xff] }
   0xc   :  { %138 = vmatpush.msra.mxu0 %v95_v7  ;;  %207 = vrot.lane.b32.xlu2 %v506_v50, %s562_s1 }
   0xe   :  { %139 = vmatpush.msra.mxu0 %v94_v9 }
   0xf   :  { %36 = vadd.xlane.f32.xlu1 %v35_v11 }
  0x10   :  { %140 = vmatpush.msra.mxu0 %v93_v12  ;;  %42 = vadd.xlane.f32.xlu0 %v41_v13 }
  0x12   :  { %141 = vmatpush.msra.mxu0 %v92_v14 }
  0x14   :  { %142 = vmatpush.msra.mxu0 %v91_v15 }
  0x15   :  { %461 = vmatmul.msk.f32.vlgmr.msra.gmra.mxu0 %vm114_vm1, %v110_v16 }
  0x1d   :  { %462 = vmatmul.msk.f32.gmra.mxu0 %vm114_vm1, %v111_v17 }
  0x25   :  { %463 = vmatmul.msk.f32.gmra.mxu0 %vm114_vm1, %v112_v18 }
  0x2d   :  { %464 = vmatmul.msk.f32.gmra.mxu0 %vm114_vm1, %v113_v19 }
  0x66   :  { %v208_v9 = vpop.permute.xlu2 %207 }
  0x7a   :  { %v40_v21 = vpop.xlane.xlu1 %39 }
  0x7b   :  { %v46_v20 = vpop.xlane.xlu0 %45  ;;  %v48_v24 = vmax.f32 %v40_v21, 1.0 }
  0x7c   :  { %v50_v23 = vmax.f32 %v46_v20, 1.0 }
  0x7d   :  { %vm67_vm4 = vweird.f32 %v48_v24 }
  0x7e   :  { %509 = vrsqrt.f32 %v50_v23  ;;  %vm87_vm2 = vweird.f32 %v50_v23 }
  0x7f   :  { %511 = vrsqrt.f32 %v48_v24 }
  0x82   :  { %v37_v25 = vpop.xlane.xlu1 %36 }
  0x83   :  { %v43_v22 = vpop.xlane.xlu0 %42  ;;  %v47_v27 = vmax.f32 %v37_v25, 1.0 }
  0x84   :  { %v49_v26 = vmax.f32 %v43_v22, 1.0  ;;  %v510_v29 = vpop.eup %509 }
  0x85   :  { %v512_v30 = vpop.eup %511  ;;  %v82_v32 = vmul.f32 %v510_v29, %v50_v23  ;;  %vm88_vm3 = vweird.f32 %v510_v29  ;;  %vm57_vm10 = vweird.f32 %v47_v27 }
  0x86   :  { %513 = vrsqrt.f32 %v49_v26  ;;  %v62_v34 = vmul.f32 %v512_v30, %v48_v24  ;;  %vm68_vm5 = vweird.f32 %v512_v30  ;;  %vm77_vm6 = vweird.f32 %v49_v26  ;;  %vm89_vm8 = vmor %vm87_vm2, %vm88_vm3 }
  0x87   :  { %515 = vrsqrt.f32 %v47_v27  ;;  %v83_v36 = vmul.f32 %v510_v29, %v82_v32  ;;  %vm69_vm9 = vmor %vm67_vm4, %vm68_vm5 }
  0x88   :  { %v63_v39 = vmul.f32 %v512_v30, %v62_v34 }
  0x89   :  { %v84_v41 = vmul.f32 0.5, %v83_v36 }
  0x8a   :  { %v64_v43 = vmul.f32 0.5, %v63_v39 }
  0x8b   :  { %v85_v45 = vsub.f32 1.5, %v84_v41 }
  0x8c   :  { %v514_v31 = vpop.eup %513  ;;  %v65_v48 = vsub.f32 1.5, %v64_v43 }
  0x8d   :  { %v516_v33 = vpop.eup %515  ;;  %v72_v35 = vmul.f32 %v514_v31, %v49_v26  ;;  %v86_v51 = vmul.f32 %v510_v29, %v85_v45  ;;  %vm78_vm7 = vweird.f32 %v514_v31  ;;  %v99_v45 = vld [vmem:[#allocation2 + $0x40] sm:$0xff] }
  0x8e   :  { %v52_v37 = vmul.f32 %v516_v33, %v47_v27  ;;  %v66_v53 = vmul.f32 %v512_v30, %v65_v48  ;;  %vm58_vm11 = vweird.f32 %v516_v33  ;;  %vm79_vm12 = vmor %vm77_vm6, %vm78_vm7  ;;  %v102_v27 = vld [vmem:[#allocation2 + $0x58] sm:$0xff] }
  0x8f   :  { %v73_v40 = vmul.f32 %v514_v31, %v72_v35  ;;  %v628_v55 = vsel %vm89_vm8, %v510_v29, %v86_v51  ;;  %vm59_vm13 = vmor %vm57_vm10, %vm58_vm11 }
  0x90   :  { %v53_v42 = vmul.f32 %v516_v33, %v52_v37  ;;  %v631_v59 = vsel %vm69_vm9, %v512_v30, %v66_v53 }
  0x91   :  { %v74_v44 = vmul.f32 0.5, %v73_v40 }
  0x92   :  { %v144_v28 = vpop.f32.mrf.mxu0  ;;  %v54_v46 = vmul.f32 0.5, %v53_v42 }
  0x93   :  { %v75_v49 = vsub.f32 1.5, %v74_v44  ;;  %v100_v44 = vld [vmem:[#allocation2 + $0x48] sm:$0xff] }
  0x94   :  { %v55_v52 = vsub.f32 1.5, %v54_v46  ;;  %v507_v46 = vld [vmem:[#allocation2 + $0x48] ss:$0 sm:$0xff] }
  0x95   :  { %v76_v54 = vmul.f32 %v514_v31, %v75_v49  ;;  %277 = vrot.lane.b32.xlu2 %v507_v46, %s562_s1 }
  0x96   :  { %v56_v56 = vmul.f32 %v516_v33, %v55_v52 }
  0x97   :  { %v633_v60 = vsel %vm79_vm12, %v514_v31, %v76_v54 }
  0x98   :  { %v636_v62 = vsel %vm59_vm13, %v516_v33, %v56_v56  ;;  %v106_v56 = vld [vmem:[#allocation2 + $0x78] sm:$0xff] }
  0x99   :  { %v156_v0 = vmul.f32 %v144_v28, %v636_v62  ;;  %v101_v28 = vld [vmem:[#allocation2 + $0x50] sm:$0xff] }
  0x9a   :  { %v147_v38 = vpop.f32.mrf.mxu0 }
  0x9b   :  { %v157_v63 = vmul.f32 %v147_v38, %v631_v59 }
  0xa2   :  { %v150_v47 = vpop.f32.mrf.mxu0 }
  0xa3   :  { %v158_v61 = vmul.f32 %v150_v47, %v633_v60 }
  0xaa   :  { %v153_v57 = vpop.f32.mrf.mxu0 }
  0xab   :  { %v159_v58 = vmul.f32 %v153_v57, %v628_v55  ;;  %v105_v57 = vld [vmem:[#allocation2 + $0x70] sm:$0xff] }
  0xad   :  { %184 = vmatpush.msra.mxu1 %v159_v58  ;;  %493 = vmatpush.msra.mxu3 %v159_v58  ;;  %v104_v58 = vld [vmem:[#allocation2 + $0x68] sm:$0xff] }
  0xaf   :  { %185 = vmatpush.msra.mxu1 %v158_v61  ;;  %494 = vmatpush.msra.mxu3 %v158_v61  ;;  %v103_v61 = vld [vmem:[#allocation2 + $0x60] sm:$0xff] }
  0xb1   :  { %186 = vmatpush.msra.mxu1 %v157_v63  ;;  %495 = vmatpush.msra.mxu3 %v157_v63 }
  0xb3   :  { %187 = vmatpush.msra.mxu1 %v156_v0  ;;  %496 = vmatpush.msra.mxu3 %v156_v0 }
  0xb4   :  { %465 = vmatmul.msk.f32.vlgmr.msra.gmra.mxu1 %vm34_vm0, %v604_v8  ;;  %466 = vmatmul.msk.f32.vlgmr.msra.gmra.mxu3 %vm34_vm0, %v590_v1 }
  0xb5   :  { %304 = vmatpush.msrb.mxu3 %v102_v27  ;;  %369 = vmatpush.msrb.mxu1 %v106_v56 }
  0xb7   :  { %305 = vmatpush.msrb.mxu3 %v101_v28  ;;  %370 = vmatpush.msrb.mxu1 %v105_v57 }
  0xb9   :  { %306 = vmatpush.msrb.mxu3 %v100_v44  ;;  %371 = vmatpush.msrb.mxu1 %v104_v58 }
  0xbb   :  { %307 = vmatpush.msrb.mxu3 %v99_v45  ;;  %372 = vmatpush.msrb.mxu1 %v103_v61 }
  0xbc   :  { %467 = vmatmul.msk.f32.gmra.mxu3 %vm34_vm0, %v609_v10 }
  0xc4   :  { %468 = vmatmul.msk.f32.gmra.mxu3 %vm34_vm0, %v597_v5 }
  0xef   :  { %v278_v63 = vpop.permute.xlu2 %277 }
 0x131   :  { %v189_v3 = vpop.f32.mrf.mxu1 }
 0x132   :  { %v201_v6 = vmul.f32 %v189_v3, %v636_v62 }
 0x134   :  { %v210_v14 = vadd.f32 %v208_v9, %v201_v6 }
 0x136   :  { %v218_v18 = vmin.f32 %v210_v14, 0.0  ;;  %vm214_vm2 = vcmp.gt.f32.partialorder %v210_v14, 0.0 }
 0x137   :  { %v192_v2 = vpop.f32.mrf.mxu3 }
 0x138   :  { %v202_v4 = vmul.f32 %v192_v2, %v631_v59  ;;  %v222_v23 = vmul.f32 1.442695, %v218_v18 }
 0x13a   :  { %v211_v12 = vadd.f32 %v208_v9, %v202_v4 }
 0x13c   :  { %v219_v16 = vmin.f32 %v211_v12, 0.0  ;;  %vm215_vm1 = vcmp.gt.f32.partialorder %v211_v12, 0.0 }
 0x13e   :  { %v224_v21 = vmul.f32 1.442695, %v219_v16 }
 0x13f   :  { %v195_v7 = vpop.f32.mrf.mxu3 }
 0x140   :  { %v203_v11 = vmul.f32 %v195_v7, %v633_v60 }
 0x142   :  { %v212_v13 = vadd.f32 %v208_v9, %v203_v11 }
 0x144   :  { %v220_v15 = vmin.f32 %v212_v13, 0.0  ;;  %vm216_vm15 = vcmp.gt.f32.partialorder %v212_v13, 0.0 }
 0x146   :  { %v226_v19 = vmul.f32 1.442695, %v220_v15 }
 0x147   :  { %v198_v17 = vpop.f32.mrf.mxu3 }
 0x148   :  { %v204_v20 = vmul.f32 %v198_v17, %v628_v55  ;;  %517 = vpow2.f32 %v226_v19 }
 0x149   :  { %519 = vpow2.f32 %v224_v21 }
 0x14a   :  { %v213_v22 = vadd.f32 %v208_v9, %v204_v20  ;;  %521 = vpow2.f32 %v222_v23 }
 0x14c   :  { %v221_v24 = vmin.f32 %v213_v22, 0.0  ;;  %vm217_vm14 = vcmp.gt.f32.partialorder %v213_v22, 0.0 }
 0x14e   :  { %v228_v25 = vmul.f32 1.442695, %v221_v24  ;;  %v518_v26 = vpop.eup %517 }
 0x14f   :  { %v520_v29 = vpop.eup %519  ;;  %v471_v31 = vadd.f32 -1.0, %v518_v26 }
 0x150   :  { %523 = vpow2.f32 %v228_v25  ;;  %v522_v30 = vpop.eup %521  ;;  %v470_v34 = vadd.f32 -1.0, %v520_v29 }
 0x151   :  { %v236_v36 = vsel %vm216_vm15, %v212_v13, %v471_v31  ;;  %v469_v37 = vadd.f32 -1.0, %v522_v30 }
 0x152   :  { %v235_v39 = vsel %vm215_vm1, %v211_v12, %v470_v34  ;;  %v240_v40 = vmul.f32 %v236_v36, %v633_v60 }
 0x153   :  { %v234_v41 = vsel %vm214_vm2, %v210_v14, %v469_v37  ;;  %v239_v42 = vmul.f32 %v235_v39, %v631_v59 }
 0x154   :  { %v238_v43 = vmul.f32 %v234_v41, %v636_v62 }
 0x156   :  { %v524_v32 = vpop.eup %523 }
 0x157   :  { %v472_v33 = vadd.f32 -1.0, %v524_v32 }
 0x159   :  { %v237_v35 = vsel %vm217_vm14, %v213_v22, %v472_v33 }
 0x15a   :  { %v241_v38 = vmul.f32 %v237_v35, %v628_v55  ;;  %v508_v35 = vld [vmem:[#allocation2 + $0x50] ss:$0 sm:$0xff] }
 0x15b   :  { %425 = vrot.lane.b32.xlu0 %v508_v35, %s562_s1 }
 0x15c   :  { %254 = vmatpush.msrb.mxu0 %v241_v38  ;;  %497 = vmatpush.msra.mxu2 %v241_v38 }
 0x15e   :  { %255 = vmatpush.msrb.mxu0 %v240_v40  ;;  %498 = vmatpush.msra.mxu2 %v240_v40 }
 0x160   :  { %256 = vmatpush.msrb.mxu0 %v239_v42  ;;  %499 = vmatpush.msra.mxu2 %v239_v42 }
 0x162   :  { %257 = vmatpush.msrb.mxu0 %v238_v43  ;;  %500 = vmatpush.msra.mxu2 %v238_v43 }
 0x163   :  { %473 = vmatmul.msk.f32.vlgmr.msrb.gmra.mxu0 %vm34_vm0, %v604_v8  ;;  %474 = vmatmul.msk.f32.vlgmr.msra.gmra.mxu2 %vm34_vm0, %v590_v1 }
 0x16b   :  { %475 = vmatmul.msk.f32.gmra.mxu2 %vm34_vm0, %v609_v10 }
 0x173   :  { %476 = vmatmul.msk.f32.gmra.mxu2 %vm34_vm0, %v597_v5 }
 0x1cd   :  { %v426_v42 = vpop.permute.xlu0 %425 }
 0x1e0   :  { %v259_v47 = vpop.f32.mrf.mxu0 }
 0x1e1   :  { %v271_v48 = vmul.f32 %v259_v47, %v636_v62 }
 0x1e3   :  { %477 = vmatmul.msk.f32.vlgmr.msrb.gmra.mxu3 %vm34_vm0, %v271_v48 }
 0x1e6   :  { %v262_v49 = vpop.f32.mrf.mxu2 }
 0x1e7   :  { %v272_v50 = vmul.f32 %v262_v49, %v631_v59 }
 0x1eb   :  { %478 = vmatmul.msk.f32.gmra.mxu3 %vm34_vm0, %v272_v50 }
 0x1ee   :  { %v265_v51 = vpop.f32.mrf.mxu2 }
 0x1ef   :  { %v273_v52 = vmul.f32 %v265_v51, %v633_v60 }
 0x1f3   :  { %479 = vmatmul.msk.f32.gmra.mxu3 %vm34_vm0, %v273_v52 }
 0x1f6   :  { %v268_v53 = vpop.f32.mrf.mxu2 }
 0x1f7   :  { %v274_v54 = vmul.f32 %v268_v53, %v628_v55 }
 0x1fb   :  { %480 = vmatmul.msk.f32.gmra.mxu3 %vm34_vm0, %v274_v54 }
 0x266   :  { %v309_v0 = vpop.f32.mrf.mxu3 }
 0x267   :  { %v310_v2 = vadd.f32 %v309_v0, %v278_v63 }
 0x269   :  { %v325_v3 = vmin.f32 %v310_v2, 0.0  ;;  %vm321_vm3 = vcmp.gt.f32.partialorder %v310_v2, 0.0 }
 0x26b   :  { %v329_v4 = vmul.f32 1.442695, %v325_v3 }
 0x26d   :  { %525 = vpow2.f32 %v329_v4 }
 0x26e   :  { %v312_v6 = vpop.f32.mrf.mxu3 }
 0x26f   :  { %v313_v7 = vadd.f32 %v312_v6, %v278_v63 }
 0x271   :  { %v326_v9 = vmin.f32 %v313_v7, 0.0  ;;  %vm322_vm4 = vcmp.gt.f32.partialorder %v313_v7, 0.0 }
 0x273   :  { %v526_v11 = vpop.eup %525  ;;  %v331_v12 = vmul.f32 1.442695, %v326_v9 }
 0x274   :  { %v481_v13 = vadd.f32 -1.0, %v526_v11 }
 0x275   :  { %527 = vpow2.f32 %v331_v12 }
 0x276   :  { %v315_v14 = vpop.f32.mrf.mxu3  ;;  %v673_v15 = vsel %vm321_vm3, %v310_v2, %v481_v13 }
 0x277   :  { %v316_v16 = vadd.f32 %v315_v14, %v278_v63  ;;  %485 = vmatmul.msk.f32.vlgmr.msrb.gmra.mxu1 %vm34_vm0, %v673_v15 }
 0x279   :  { %v327_v17 = vmin.f32 %v316_v16, 0.0  ;;  %vm323_vm5 = vcmp.gt.f32.partialorder %v316_v16, 0.0 }
 0x27b   :  { %v528_v18 = vpop.eup %527  ;;  %v333_v19 = vmul.f32 1.442695, %v327_v17 }
 0x27c   :  { %v482_v20 = vadd.f32 -1.0, %v528_v18 }
 0x27d   :  { %529 = vpow2.f32 %v333_v19 }
 0x27e   :  { %v318_v21 = vpop.f32.mrf.mxu3  ;;  %v342_v22 = vsel %vm322_vm4, %v313_v7, %v482_v20 }
 0x27f   :  { %v319_v23 = vadd.f32 %v318_v21, %v278_v63  ;;  %486 = vmatmul.msk.f32.gmra.mxu1 %vm34_vm0, %v342_v22 }
 0x281   :  { %v328_v24 = vmin.f32 %v319_v23, 0.0  ;;  %vm324_vm6 = vcmp.gt.f32.partialorder %v319_v23, 0.0 }
 0x283   :  { %v530_v25 = vpop.eup %529  ;;  %v335_v26 = vmul.f32 1.442695, %v328_v24 }
 0x284   :  { %v483_v27 = vadd.f32 -1.0, %v530_v25 }
 0x285   :  { %531 = vpow2.f32 %v335_v26 }
 0x286   :  { %v343_v28 = vsel %vm323_vm5, %v316_v16, %v483_v27 }
 0x287   :  { %487 = vmatmul.msk.f32.gmra.mxu1 %vm34_vm0, %v343_v28 }
 0x28b   :  { %v532_v29 = vpop.eup %531 }
 0x28c   :  { %v484_v30 = vadd.f32 -1.0, %v532_v29 }
 0x28e   :  { %v344_v31 = vsel %vm324_vm6, %v319_v23, %v484_v30 }
 0x28f   :  { %488 = vmatmul.msk.f32.gmra.mxu1 %vm34_vm0, %v344_v31 }
 0x2f4   :  { %v374_v32 = vpop.f32.mrf.mxu1 }
 0x2f5   :  { %v386_v40 = vmul.f32 %v374_v32, %v636_v62 }
 0x2fc   :  { %v377_v33 = vpop.f32.mrf.mxu1 }
 0x2fd   :  { %v387_v39 = vmul.f32 %v377_v33, %v631_v59 }
 0x304   :  { %v380_v34 = vpop.f32.mrf.mxu1 }
 0x305   :  { %v388_v38 = vmul.f32 %v380_v34, %v633_v60 }
 0x30c   :  { %v383_v36 = vpop.f32.mrf.mxu1 }
 0x30d   :  { %v389_v37 = vmul.f32 %v383_v36, %v628_v55 }
 0x30f   :  { %402 = vmatpush.msrb.mxu2 %v389_v37 }
 0x311   :  { %403 = vmatpush.msrb.mxu2 %v388_v38 }
 0x313   :  { %404 = vmatpush.msrb.mxu2 %v387_v39 }
 0x315   :  { %405 = vmatpush.msrb.mxu2 %v386_v40 }
 0x316   :  { %489 = vmatmul.msk.f32.vlgmr.msrb.gmra.mxu2 %vm34_vm0, %v604_v8 }
 0x31e   :  { %490 = vmatmul.msk.f32.gmra.mxu2 %vm34_vm0, %v590_v1 }
 0x326   :  { %491 = vmatmul.msk.f32.gmra.mxu2 %vm34_vm0, %v609_v10 }
 0x32e   :  { %492 = vmatmul.msk.f32.gmra.mxu2 %vm34_vm0, %v597_v5 }
 0x399   :  { %v407_v41 = vpop.f32.mrf.mxu2 }
 0x39a   :  { %v419_v43 = vmul.f32 %v407_v41, %v636_v62 }
 0x39c   :  { %v428_v44 = vadd.f32 %v426_v42, %v419_v43 }
 0x39e   :  { %436 = vrot.lane.b32.xlu1 %v428_v44, %s563_s6 }
 0x3a1   :  { %v410_v45 = vpop.f32.mrf.mxu2 }
 0x3a2   :  { %v420_v46 = vmul.f32 %v410_v45, %v631_v59 }
 0x3a4   :  { %v429_v8 = vadd.f32 %v426_v42, %v420_v46 }
 0x3a6   :  { %438 = vrot.lane.b32.xlu2 %v429_v8, %s563_s6 }
 0x3a9   :  { %v413_v47 = vpop.f32.mrf.mxu2 }
 0x3aa   :  { %v421_v1 = vmul.f32 %v413_v47, %v633_v60 }
 0x3ac   :  { %v430_v48 = vadd.f32 %v426_v42, %v421_v1 }
 0x3ae   :  { %440 = vrot.lane.b32.xlu2 %v430_v48, %s563_s6 }
 0x3b1   :  { %v416_v10 = vpop.f32.mrf.mxu2 }
 0x3b2   :  { %v422_v5 = vmul.f32 %v416_v10, %v628_v55 }
 0x3b4   :  { %v431_v49 = vadd.f32 %v426_v42, %v422_v5 }
 0x3b6   :  { %442 = vrot.lane.b32.xlu2 %v431_v49, %s563_s6 }
 0x400   :  { %v439_v50 = vpop.permute.xlu2 %438 }
 0x401   :  { %v449_v62 = vsel %vm34_vm0, %v342_v22, %v439_v50 }
 0x402   :  { %453 = vst [vmem:[%s717_s3 + $0x8] sm:$0xff] %v449_v62 }
 0x408   :  { %v441_v59 = vpop.permute.xlu2 %440 }
 0x409   :  { %v450_v51 = vsel %vm34_vm0, %v343_v28, %v441_v59 }
 0x40a   :  { %454 = vst [vmem:[%s717_s3 + $0x10] sm:$0xff] %v450_v51 }
 0x410   :  { %v437_v60 = vpop.permute.xlu1 %436  ;;  %v443_v52 = vpop.permute.xlu2 %442 }
 0x411   :  { %v448_v55 = vsel %vm34_vm0, %v673_v15, %v437_v60  ;;  %v451_v53 = vsel %vm34_vm0, %v344_v31, %v443_v52 }
 0x412   :  { %452 = vst [vmem:[%s717_s3] sm:$0xff] %v448_v55 }
 0x413   :  { %455 = vst [vmem:[%s717_s3 + $0x18] sm:$0xff] %v451_v53 }
 0x414   :  { %460 = vsyncpa [#allocation3], 1 }

</bundles_post_ra>
